<compile_context>
chip_gen: v5e
topology: v5e:2x2
jax: 0.10.0
libtpu: 0.0.40
codegen_flags: <defaults>
</compile_context>

<pallas_src>
import functools

import jax
import jax.numpy as jnp
from jax.experimental import pallas as pl
from jax.experimental.pallas import tpu as pltpu

LANE = 128  # TPU lane width


# --------------------------------------------------------------------------- #
# Helpers
# --------------------------------------------------------------------------- #
def _round_up(x, m):
    return ((x + m - 1) // m) * m


def _pad2(a, rows, cols, dtype):
    """Zero-pad a 2-D array to (rows, cols) and cast to dtype (runs once)."""
    out = jnp.zeros((rows, cols), dtype)
    return out.at[: a.shape[0], : a.shape[1]].set(a.astype(dtype))


def _tpu_meta():
    """Best-effort hardware query (VMEM capacity, chip generation)."""
    vmem = 64 << 20  # conservative default (v7x per-TC VMEM)
    try:
        v = getattr(pltpu.get_tpu_info(), "vmem_capacity_bytes", None)
        if v:
            vmem = int(v)
    except Exception:
        pass
    kind = ""
    try:
        kind = jax.devices()[0].device_kind.lower()
    except Exception:
        pass
    return vmem, ("v7" in kind), ("v5" in kind)


def _resident(shape):
    """BlockSpec for a weight/bias resident across all grid steps.

    Constant index_map -> DMA'd once; single-buffered (double-buffering a
    constant block buys nothing and doubles its VMEM footprint).
    """
    try:
        return pl.BlockSpec(shape, lambda i: (0, 0), pipeline_mode=pl.Buffered(1))
    except TypeError:  # older API without pipeline_mode
        return pl.BlockSpec(shape, lambda i: (0, 0))


def _pick_div_tile(dim, cap):
    """Largest multiple-of-128 divisor of dim (dim is a multiple of 128) <= cap."""
    for t in (1024, 512, 256, 128):
        if t <= cap and dim % t == 0:
            return t
    return 128


# --------------------------------------------------------------------------- #
# Kernels
# --------------------------------------------------------------------------- #
def _mlp_kernel(x_ref, w1_ref, b1_ref, w2_ref, b2_ref, w3_ref, b3_ref, o_ref):
    cdt = w2_ref.dtype  # MXU compute dtype (bf16)

    # Layer 1: x @ W1 (MXU, f32 acc) -> bias + ReLU epilogue in the bias dtype
    # (bf16 on v6e/v7x, f32 on v5e), then cast to the MXU dtype for layer 2.
    h = jnp.dot(x_ref[...], w1_ref[...], preferred_element_type=jnp.float32)
    h = jnp.maximum(h.astype(b1_ref.dtype) + b1_ref[...], 0.0).astype(cdt)

    # Layer 2
    h = jnp.dot(h, w2_ref[...], preferred_element_type=jnp.float32)
    h = jnp.maximum(h.astype(b2_ref.dtype) + b2_ref[...], 0.0).astype(cdt)

    # Layer 3: f32 bias add, lane-dense store.
    out = jnp.dot(h, w3_ref[...], preferred_element_type=jnp.float32)
    o_ref[...] = (out + b3_ref[...].astype(jnp.float32)).astype(o_ref.dtype)


def _linear_kernel(x_ref, w_ref, b_ref, o_ref, acc_ref, *, relu):
    """Fallback per-layer tiled matmul: grid=(M, N, K), K accumulates in VMEM."""
    @pl.when(pl.program_id(2) == 0)
    def _():
        acc_ref[...] = jnp.zeros_like(acc_ref)

    acc_ref[...] += jnp.dot(x_ref[...], w_ref[...],
                            preferred_element_type=jnp.float32)

    @pl.when(pl.program_id(2) == pl.num_programs(2) - 1)
    def _():
        y = acc_ref[...] + b_ref[...].astype(jnp.float32)
        if relu:
            y = jnp.maximum(y, 0.0)
        o_ref[...] = y.astype(o_ref.dtype)


def _linear_pallas(x, w, b, *, relu, out_dtype, tm, tn, tk, vmem_cap):
    M, K = x.shape
    _, N = w.shape
    est = (2 * (tm * tk + tk * tn) * jnp.dtype(x.dtype).itemsize
           + 2 * tm * tn * jnp.dtype(out_dtype).itemsize
           + tm * tn * 4 + 2 * tn * 4)
    vmem_limit = int(min(max(2 * est, 8 << 20), vmem_cap))
    return pl.pallas_call(
        functools.partial(_linear_kernel, relu=relu),
        out_shape=jax.ShapeDtypeStruct((M, N), out_dtype),
        grid=(pl.cdiv(M, tm), N // tn, K // tk),
        in_specs=[
            pl.BlockSpec((tm, tk), lambda i, j, k: (i, k)),
            pl.BlockSpec((tk, tn), lambda i, j, k: (k, j)),
            pl.BlockSpec((1, tn), lambda i, j, k: (0, j)),
        ],
        out_specs=pl.BlockSpec((tm, tn), lambda i, j, k: (i, j)),
        scratch_shapes=[pltpu.VMEM((tm, tn), jnp.float32)],
        compiler_params=pltpu.CompilerParams(
            dimension_semantics=("parallel", "parallel", "arbitrary"),
            vmem_limit_bytes=vmem_limit,
        ),
    )(x, w, b)


# --------------------------------------------------------------------------- #
# Parameter preparation (once, outside the per-call forward)
# --------------------------------------------------------------------------- #
def prepare_params(w1, b1, w2, b2, w3, b3, *, compute_dtype=jnp.bfloat16):
    """Pad feature dims to 128 lanes and cast once; returns (params, meta)."""
    vmem_bytes, is_v7, is_v5 = _tpu_meta()
    d_in, d_hid = w1.shape
    d_out = w3.shape[1]
    d_in_p = _round_up(d_in, LANE)
    d_hid_p = _round_up(d_hid, LANE)
    d_out_p = _round_up(d_out, LANE)

    # bf16 inter-layer bias/ReLU epilogue on chips with a bf16 VPU; f32 on v5e.
    bias12_dtype = jnp.float32 if is_v5 else compute_dtype

    params = dict(
        w1=_pad2(w1, d_in_p, d_hid_p, compute_dtype),
        b1=_pad2(jnp.asarray(b1).reshape(1, -1), 1, d_hid_p, bias12_dtype),
        w2=_pad2(w2, d_hid_p, d_hid_p, compute_dtype),
        b2=_pad2(jnp.asarray(b2).reshape(1, -1), 1, d_hid_p, bias12_dtype),
        w3=_pad2(w3, d_hid_p, d_out_p, compute_dtype),
        b3=_pad2(jnp.asarray(b3).reshape(1, -1), 1, d_out_p, jnp.float32),
    )
    meta = dict(d_in=d_in, d_out=d_out, d_in_p=d_in_p, d_hid_p=d_hid_p,
                d_out_p=d_out_p, vmem_bytes=vmem_bytes, is_v7=is_v7,
                is_v5=is_v5, compute_dtype=compute_dtype,
                bias12_dtype=bias12_dtype)
    return params, meta


# --------------------------------------------------------------------------- #
# Forward builder
# --------------------------------------------------------------------------- #
def make_mlp_forward(meta, *, out_dtype=jnp.float32, force_unfused=False):
    """Returns a jitted forward(x, params) -> (B, num_classes)."""
    d_in, d_out = meta["d_in"], meta["d_out"]
    d_in_p, d_hid_p, d_out_p = meta["d_in_p"], meta["d_hid_p"], meta["d_out_p"]
    cdt = meta["compute_dtype"]
    cdt_size = jnp.dtype(cdt).itemsize
    b12_size = jnp.dtype(meta["bias12_dtype"]).itemsize
    out_size = jnp.dtype(out_dtype).itemsize
    vmem = meta["vmem_bytes"]

    n_split = 2 if meta["is_v7"] else 1              # v7x: 2 TensorCores/chip
    row_cap = 512 if vmem <= (64 << 20) else 1024    # bigger tiles on 128 MiB chips
    vmem_cap = max(min(vmem * 3 // 4, vmem - (32 << 20)), 16 << 20)

    w_bytes = (d_in_p * d_hid_p + d_hid_p * d_hid_p + d_hid_p * d_out_p) * cdt_size
    b_bytes = 2 * d_hid_p * b12_size + d_out_p * 4

    def _pick_tile_b(B):
        # Split batch across TensorCores on v7x; tiles in multiples of 8 rows.
        t = _round_up(max(1, -(-B // n_split)), 8)
        return max(8, min(t, row_cap, _round_up(B, 8)))

    def _fused(xp, p, B, tile_b, est):
        vmem_limit = int(min(max(est * 3 // 2, 4 << 20), vmem_cap))
        return pl.pallas_call(
            _mlp_kernel,
            out_shape=jax.ShapeDtypeStruct((B, d_out_p), out_dtype),
            grid=(pl.cdiv(B, tile_b),),
            in_specs=[
                pl.BlockSpec((tile_b, d_in_p), lambda i: (i, 0)),  # x: batch-tiled
                _resident((d_in_p, d_hid_p)), _resident((1, d_hid_p)),
                _resident((d_hid_p, d_hid_p)), _resident((1, d_hid_p)),
                _resident((d_hid_p, d_out_p)), _resident((1, d_out_p)),
            ],
            out_specs=pl.BlockSpec((tile_b, d_out_p), lambda i: (i, 0)),
            compiler_params=pltpu.CompilerParams(
                dimension_semantics=("parallel",),
                vmem_limit_bytes=vmem_limit,
            ),
        )(xp, p["w1"], p["b1"], p["w2"], p["b2"], p["w3"], p["b3"])

    def _unfused(xp, p, tile_b):
        # Per-layer tiled matmul fallback when resident weights don't fit VMEM.
        tk1 = _pick_div_tile(d_in_p, 1024)
        tkh = _pick_div_tile(d_hid_p, 1024)
        tnh = _pick_div_tile(d_hid_p, 512)
        tno = _pick_div_tile(d_out_p, 512)
        h = _linear_pallas(xp, p["w1"], p["b1"], relu=True, out_dtype=cdt,
                           tm=tile_b, tn=tnh, tk=tk1, vmem_cap=vmem_cap)
        h = _linear_pallas(h, p["w2"], p["b2"], relu=True, out_dtype=cdt,
                           tm=tile_b, tn=tnh, tk=tkh, vmem_cap=vmem_cap)
        return _linear_pallas(h, p["w3"], p["b3"], relu=False, out_dtype=out_dtype,
                              tm=tile_b, tn=tno, tk=tkh, vmem_cap=vmem_cap)

    @jax.jit
    def forward(x, params):
        B = x.shape[0]
        tile_b = _pick_tile_b(B)

        xp = x.astype(cdt)
        if d_in_p != d_in:  # column-pad only when needed; no batch padding
            xp = jnp.pad(xp, ((0, 0), (0, d_in_p - d_in)))

        # Fused-path VMEM footprint: x/out tiles double-buffered, weights and
        # biases resident single-buffered, headroom for f32 intermediates.
        est = (tile_b * d_in_p * cdt_size * 2
               + tile_b * d_out_p * out_size * 2
               + w_bytes + b_bytes
               + tile_b * max(d_hid_p, d_out_p) * 4 * 3)

        if force_unfused or est > vmem_cap:
            out = _unfused(xp, params, tile_b)
        else:
            out = _fused(xp, params, B, tile_b, est)

        return out[:, :d_out] if d_out_p != d_out else out

    return forward


# --------------------------------------------------------------------------- #
# Init (mimics nn.Linear's U(-1/sqrt(fan_in), 1/sqrt(fan_in)))
# --------------------------------------------------------------------------- #
def init_params(key, size_input, size_hidden, num_classes):
    ks = jax.random.split(key, 6)

    def linear(kw, kb, fan_in, fan_out):
        bound = 1.0 / jnp.sqrt(fan_in)
        w = jax.random.uniform(kw, (fan_in, fan_out), jnp.float32, -bound, bound)
        b = jax.random.uniform(kb, (1, fan_out), jnp.float32, -bound, bound)
        return w, b

    w1, b1 = linear(ks[0], ks[1], size_input, size_hidden)
    w2, b2 = linear(ks[2], ks[3], size_hidden, size_hidden)
    w3, b3 = linear(ks[4], ks[5], size_hidden, num_classes)
    return w1, b1, w2, b2, w3, b3


# --------------------------------------------------------------------------- #
# Demo / self-test
# --------------------------------------------------------------------------- #
if __name__ == "__main__":
    size_input, size_hidden, num_classes = 32, 32, 16
    batch = 8

    key = jax.random.PRNGKey(0)
    k_x, k_p = jax.random.split(key)

    x = jax.random.normal(k_x, (batch, size_input), jnp.float32)
    w1, b1, w2, b2, w3, b3 = init_params(k_p, size_input, size_hidden, num_classes)

    params, meta = prepare_params(w1, b1, w2, b2, w3, b3)
    forward = make_mlp_forward(meta)

    out = jax.block_until_ready(forward(x, params))
    assert out.shape == (batch, num_classes)
    assert out.dtype == jnp.float32

    # Reference with the same bf16-matmul / f32-accumulation / epilogue dtype
    # as the kernel.
    cdtt = params["w1"].dtype
    bdt = params["b1"].dtype
    h = jnp.dot(x.astype(cdtt), w1.astype(cdtt), preferred_element_type=jnp.float32)
    h = jnp.maximum(h.astype(bdt) + b1.astype(bdt), 0.0).astype(cdtt)
    h = jnp.dot(h, w2.astype(cdtt), preferred_element_type=jnp.float32)
    h = jnp.maximum(h.astype(bdt) + b2.astype(bdt), 0.0).astype(cdtt)
    h = jnp.dot(h, w3.astype(cdtt), preferred_element_type=jnp.float32)
    ref = (h + b3).astype(jnp.float32)
    assert jnp.allclose(out, ref, atol=2e-3, rtol=2e-3), (
        float(jnp.max(jnp.abs(out - ref))))

    # Loose sanity check against the full-f32 PyTorch-equivalent forward.
    ref32 = jnp.maximum(x @ w1 + b1, 0.0)
    ref32 = jnp.maximum(ref32 @ w2 + b2, 0.0)
    ref32 = ref32 @ w3 + b3
    assert jnp.allclose(out, ref32, atol=8e-2, rtol=8e-2)

    # Exercise the large-weight fallback path (per-layer tiled matmul).
    forward_tiled = make_mlp_forward(meta, force_unfused=True)
    out2 = jax.block_until_ready(forward_tiled(x, params))
    assert out2.shape == (batch, num_classes)
    assert jnp.allclose(out2, out, atol=2e-2, rtol=2e-2)

    print("KERNEL_OK")
</pallas_src>

<mosaic_0001>
module attributes {stable_mosaic.version = 11 : i64} {
  func.func @_mlp_kernel(%arg0: i32, %arg1: memref<8x128xbf16, #tpu.memory_space<vmem>>, %arg2: memref<128x128xbf16, #tpu.memory_space<vmem>>, %arg3: memref<1x128xbf16, #tpu.memory_space<vmem>>, %arg4: memref<128x128xbf16, #tpu.memory_space<vmem>>, %arg5: memref<1x128xbf16, #tpu.memory_space<vmem>>, %arg6: memref<128x128xbf16, #tpu.memory_space<vmem>>, %arg7: memref<1x128xf32, #tpu.memory_space<vmem>>, %arg8: memref<8x128xf32, #tpu.memory_space<vmem>>) attributes {dimension_semantics = [#tpu.dimension_semantics<parallel>], iteration_bounds = array<i64: 1>, scalar_prefetch = 0 : i64, scratch_operands = 0 : i64, tpu.core_type = #tpu.core_type<tc>, window_params = [{transform_indices = @transform_0, window_bounds = array<i64: 8, 128>}, {pipeline_mode = #tpu.pipeline_mode<synchronous>, transform_indices = @transform_1, window_bounds = array<i64: 128, 128>}, {pipeline_mode = #tpu.pipeline_mode<synchronous>, transform_indices = @transform_2, window_bounds = array<i64: 1, 128>}, {pipeline_mode = #tpu.pipeline_mode<synchronous>, transform_indices = @transform_3, window_bounds = array<i64: 128, 128>}, {pipeline_mode = #tpu.pipeline_mode<synchronous>, transform_indices = @transform_4, window_bounds = array<i64: 1, 128>}, {pipeline_mode = #tpu.pipeline_mode<synchronous>, transform_indices = @transform_5, window_bounds = array<i64: 128, 128>}, {pipeline_mode = #tpu.pipeline_mode<synchronous>, transform_indices = @transform_6, window_bounds = array<i64: 1, 128>}, {transform_indices = @transform_7, window_bounds = array<i64: 8, 128>}]} {
    %c0 = arith.constant 0 : index
    %c0_0 = arith.constant 0 : index
    %0 = vector.load %arg1[%c0, %c0_0] : memref<8x128xbf16, #tpu.memory_space<vmem>>, vector<8x128xbf16>
    %c0_1 = arith.constant 0 : index
    %c0_2 = arith.constant 0 : index
    %1 = vector.load %arg2[%c0_1, %c0_2] : memref<128x128xbf16, #tpu.memory_space<vmem>>, vector<128x128xbf16>
    %cst = arith.constant dense<0.000000e+00> : vector<8x128xf32>
    %2 = tpu.matmul %0, %1, %cst {dimension_numbers = #tpu.dot_dimension_numbers<[1], [0], [0], [1], [0, 0, 1, 1], [], []>} : vector<8x128xbf16>, vector<128x128xbf16>, vector<8x128xf32> -> vector<8x128xf32>
    %3 = arith.truncf %2 : vector<8x128xf32> to vector<8x128xbf16>
    %c0_3 = arith.constant 0 : index
    %c0_4 = arith.constant 0 : index
    %4 = vector.load %arg3[%c0_3, %c0_4] : memref<1x128xbf16, #tpu.memory_space<vmem>>, vector<1x128xbf16>
    %5 = vector.broadcast %4 : vector<1x128xbf16> to vector<8x128xbf16>
    %6 = arith.addf %3, %5 : vector<8x128xbf16>
    %cst_5 = arith.constant 0.000000e+00 : bf16
    %7 = vector.broadcast %cst_5 : bf16 to vector<8x128xbf16>
    %8 = arith.maximumf %6, %7 : vector<8x128xbf16>
    %c0_6 = arith.constant 0 : index
    %c0_7 = arith.constant 0 : index
    %9 = vector.load %arg4[%c0_6, %c0_7] : memref<128x128xbf16, #tpu.memory_space<vmem>>, vector<128x128xbf16>
    %cst_8 = arith.constant dense<0.000000e+00> : vector<8x128xf32>
    %10 = tpu.matmul %8, %9, %cst_8 {dimension_numbers = #tpu.dot_dimension_numbers<[1], [0], [0], [1], [0, 0, 1, 1], [], []>} : vector<8x128xbf16>, vector<128x128xbf16>, vector<8x128xf32> -> vector<8x128xf32>
    %11 = arith.truncf %10 : vector<8x128xf32> to vector<8x128xbf16>
    %c0_9 = arith.constant 0 : index
    %c0_10 = arith.constant 0 : index
    %12 = vector.load %arg5[%c0_9, %c0_10] : memref<1x128xbf16, #tpu.memory_space<vmem>>, vector<1x128xbf16>
    %13 = vector.broadcast %12 : vector<1x128xbf16> to vector<8x128xbf16>
    %14 = arith.addf %11, %13 : vector<8x128xbf16>
    %cst_11 = arith.constant 0.000000e+00 : bf16
    %15 = vector.broadcast %cst_11 : bf16 to vector<8x128xbf16>
    %16 = arith.maximumf %14, %15 : vector<8x128xbf16>
    %c0_12 = arith.constant 0 : index
    %c0_13 = arith.constant 0 : index
    %17 = vector.load %arg6[%c0_12, %c0_13] : memref<128x128xbf16, #tpu.memory_space<vmem>>, vector<128x128xbf16>
    %cst_14 = arith.constant dense<0.000000e+00> : vector<8x128xf32>
    %18 = tpu.matmul %16, %17, %cst_14 {dimension_numbers = #tpu.dot_dimension_numbers<[1], [0], [0], [1], [0, 0, 1, 1], [], []>} : vector<8x128xbf16>, vector<128x128xbf16>, vector<8x128xf32> -> vector<8x128xf32>
    %c0_15 = arith.constant 0 : index
    %c0_16 = arith.constant 0 : index
    %19 = vector.load %arg7[%c0_15, %c0_16] : memref<1x128xf32, #tpu.memory_space<vmem>>, vector<1x128xf32>
    %20 = vector.broadcast %19 : vector<1x128xf32> to vector<8x128xf32>
    %21 = arith.addf %18, %20 : vector<8x128xf32>
    %c0_17 = arith.constant 0 : index
    %c0_18 = arith.constant 0 : index
    %22 = vector.load %arg8[%c0_17, %c0_18] : memref<8x128xf32, #tpu.memory_space<vmem>>, vector<8x128xf32>
    tpu.vector_store %arg8[%c0_17, %c0_18], %21 {strides = array<i32>} : memref<8x128xf32, #tpu.memory_space<vmem>>, vector<8x128xf32>,
    return
  }
  func.func @transform_0(%arg0: i32) -> (i32, i32) {
    %c0_i32 = arith.constant 0 : i32
    %c0_i32_0 = arith.constant 0 : i32
    return %arg0, %c0_i32 : i32, i32
  }
  func.func @transform_1(%arg0: i32) -> (i32, i32) {
    %c0_i32 = arith.constant 0 : i32
    %c0_i32_0 = arith.constant 0 : i32
    %c0_i32_1 = arith.constant 0 : i32
    return %c0_i32, %c0_i32_0 : i32, i32
  }
  func.func @transform_2(%arg0: i32) -> (i32, i32) {
    %c0_i32 = arith.constant 0 : i32
    %c0_i32_0 = arith.constant 0 : i32
    %c0_i32_1 = arith.constant 0 : i32
    return %c0_i32, %c0_i32_0 : i32, i32
  }
  func.func @transform_3(%arg0: i32) -> (i32, i32) {
    %c0_i32 = arith.constant 0 : i32
    %c0_i32_0 = arith.constant 0 : i32
    %c0_i32_1 = arith.constant 0 : i32
    return %c0_i32, %c0_i32_0 : i32, i32
  }
  func.func @transform_4(%arg0: i32) -> (i32, i32) {
    %c0_i32 = arith.constant 0 : i32
    %c0_i32_0 = arith.constant 0 : i32
    %c0_i32_1 = arith.constant 0 : i32
    return %c0_i32, %c0_i32_0 : i32, i32
  }
  func.func @transform_5(%arg0: i32) -> (i32, i32) {
    %c0_i32 = arith.constant 0 : i32
    %c0_i32_0 = arith.constant 0 : i32
    %c0_i32_1 = arith.constant 0 : i32
    return %c0_i32, %c0_i32_0 : i32, i32
  }
  func.func @transform_6(%arg0: i32) -> (i32, i32) {
    %c0_i32 = arith.constant 0 : i32
    %c0_i32_0 = arith.constant 0 : i32
    %c0_i32_1 = arith.constant 0 : i32
    return %c0_i32, %c0_i32_0 : i32, i32
  }
  func.func @transform_7(%arg0: i32) -> (i32, i32) {
    %c0_i32 = arith.constant 0 : i32
    %c0_i32_0 = arith.constant 0 : i32
    return %arg0, %c0_i32 : i32, i32
  }
}

</mosaic_0001>

<bundles_post_ra>
// kernel: forward.1
= control target key start
LH: loop header
LB: loop body
LE: loop exit
PB: predicated region body
PF: predicated region fallthrough
CT: control target
= control target key end

     0   :  { %12 = vsyncpa [#allocation3], 0  ;;  %s654_s0 = inlined_call_operand.vmem [shape: bf16[8,128], index: 0, kind: input, shape index: {}]   ;;  %s655_s1 = inlined_call_operand.hbm [shape: bf16[128,128], index: 1, kind: input, shape index: {}]   ;;  %s656_s2 = inlined_call_operand.vmem [shape: bf16[1,128], index: 2, kind: input, shape index: {}]   ;;  %s657_s3 = inlined_call_operand.hbm [shape: bf16[128,128], index: 3, kind: input, shape index: {}]   ;;  %s658_s4 = inlined_call_operand.vmem [shape: bf16[1,128], index: 4, kind: input, shape index: {}]   ;;  %s659_s5 = inlined_call_operand.hbm [shape: bf16[128,128], index: 5, kind: input, shape index: {}]   ;;  %s660_s6 = inlined_call_operand.vmem [shape: f32[1,128], index: 6, kind: input, shape index: {}]   ;;  %s661_s7 = inlined_call_operand.hbm [shape: f32[8,128], index: 7, kind: output, shape index: {}]  }
   0x1   :  { %13 = vsyncpa [#allocation6], 0 }
   0x2   :  { %14 = vsyncpa [#allocation4], 0  ;;  %s36_s26 = sshll.u32 %s657_s3, 4  ;;  %s584_s27 = smov [#allocation5]   ;;  %s37_s26 = int_to_ptr.hbm [resolvable:$true] %s36_s26 }
   0x3   :  { %s38_s28 = sshll.u32 %s584_s27, 4  ;;  %s21_s8 = sshll.u32 %s655_s1, 4  ;;  %s39_s28 = int_to_ptr.vmem [resolvable:$true] %s38_s28  ;;  %s22_s8 = int_to_ptr.hbm [resolvable:$true] %s21_s8 }
   0x4   :  { %s585_s9 = smov 64   ;;  %s586_s10 = smov 4  }
   0x5   :  { %44 = dma.hbm_to_vmem [thread:$0]  %s37_s26, 1024, %s39_s28, [#allocation6], %s585_s9, %s585_s9, %s586_s10  }
   0x6   :  { %s587_s11 = smov [#allocation2]   ;;  %s51_s15 = sshll.u32 %s659_s5, 4  ;;  %s52_s15 = int_to_ptr.hbm [resolvable:$true] %s51_s15 }
   0x7   :  { %s23_s12 = sshll.u32 %s587_s11, 4  ;;  %s588_s3 = smov [#allocation7]   ;;  %s24_s12 = int_to_ptr.vmem [resolvable:$true] %s23_s12 }
   0x8   :  { %29 = dma.hbm_to_vmem [thread:$0]  %s22_s8, 1024, %s24_s12, [#allocation3], %s585_s9, %s585_s9, %s586_s10  }
   0x9   :  { %s53_s16 = sshll.u32 %s588_s3, 4  ;;  %s54_s16 = int_to_ptr.vmem [resolvable:$true] %s53_s16 }
   0xa   :  { %59 = dma.hbm_to_vmem [thread:$0]  %s52_s15, 1024, %s54_s16, [#allocation6], %s585_s9, %s585_s9, %s586_s10  }
   0xb   :  { %578 = dma.done.wait [#allocation3], 1024  }
   0xc   :  { %579 = vsyncadd [#allocation3], 4294966272 }
   0xd   :  { %580 = dma.done.wait [#allocation6], 2048  }
   0xe   :  { %581 = vsyncadd [#allocation6], 4294965248  ;;  %v458_v0 = vld [vmem:[#allocation2 + $0x38] sm:$0xff]  ;;  %v457_v1 = vld [vmem:[#allocation2 + $0x30] sm:$0xff]  ;;  %s589_s21 = smov [#allocation8]  }
   0xf   :  { %139 = vmatpush.bf16.msra.mxu0 %v458_v0  ;;  %v466_v2 = vld [vmem:[#allocation5 + $0x38] sm:$0xff]  ;;  %v465_v3 = vld [vmem:[#allocation5 + $0x30] sm:$0xff]  ;;  %v456_v4 = vld [vmem:[#allocation2 + $0x28] sm:$0xff]  ;;  %s342_s22 = sshll.u32 %s589_s21, 4  ;;  %s343_s22 = int_to_ptr.vmem [resolvable:$true] %s342_s22 }
  0x10   :  { %229 = vmatpush.bf16.msra.mxu1 %v466_v2  ;;  %v464_v5 = vld [vmem:[#allocation5 + $0x28] sm:$0xff]  ;;  %v455_v6 = vld [vmem:[#allocation2 + $0x20] sm:$0xff]  ;;  %v454_v8 = vld [vmem:[#allocation2 + $0x18] sm:$0xff] }
  0x11   :  { %v463_v7 = vld [vmem:[#allocation5 + $0x20] sm:$0xff]  ;;  %v462_v9 = vld [vmem:[#allocation5 + $0x18] sm:$0xff]  ;;  %v453_v10 = vld [vmem:[#allocation2 + $0x10] sm:$0xff] }
  0x12   :  { %v452_v11 = vld [vmem:[#allocation2 + $0x8] sm:$0xff]  ;;  %v451_v12 = vld [vmem:[#allocation2] sm:$0xff]  ;;  %v461_v14 = vld [vmem:[#allocation5 + $0x10] sm:$0xff] }
  0x13   :  { %140 = vmatpush.bf16.msra.mxu0 %v457_v1  ;;  %v74_v13 = vld [vmem:[%s654_s0] sm:$0xf]  ;;  %v460_v15 = vld [vmem:[#allocation5 + $0x8] sm:$0xff]  ;;  %v474_v17 = vld [vmem:[#allocation7 + $0x38] sm:$0xff] }
  0x14   :  { %230 = vmatpush.bf16.msra.mxu1 %v465_v3  ;;  %v459_v16 = vld [vmem:[#allocation5] sm:$0xff]  ;;  %323 = vmatpush.bf16.msra.mxu2 %v474_v17  ;;  %v473_v18 = vld [vmem:[#allocation7 + $0x30] sm:$0xff]  ;;  %v472_v19 = vld [vmem:[#allocation7 + $0x28] sm:$0xff] }
  0x15   :  { %v471_v20 = vld [vmem:[#allocation7 + $0x20] sm:$0xff]  ;;  %v470_v23 = vld [vmem:[#allocation7 + $0x18] sm:$0xff]  ;;  %v469_v33 = vld [vmem:[#allocation7 + $0x10] sm:$0xff] }
  0x16   :  { %v153_v21 = vld [vmem:[%s656_s2] sm:$0x1]  ;;  %v468_v34 = vld [vmem:[#allocation7 + $0x8] sm:$0xff] }
  0x17   :  { %141 = vmatpush.bf16.msra.mxu0 %v456_v4  ;;  %v155_v22 = vpack.i.b16 %v153_v21, %v153_v21  ;;  %v467_v35 = vld [vmem:[#allocation7] sm:$0xff] }
  0x18   :  { %231 = vmatpush.bf16.msra.mxu1 %v464_v5  ;;  %324 = vmatpush.bf16.msra.mxu2 %v473_v18  ;;  %v243_v36 = vld [vmem:[%s658_s4] sm:$0x1]  ;;  %s344_s4 = sshll.u32 %s661_s7, 4  ;;  %s345_s4 = int_to_ptr.hbm [resolvable:$true] %s344_s4 }
  0x19   :  { %v157_v24 = vperm.slane %v155_v22, 0  ;;  %v245_v37 = vpack.i.b16 %v243_v36, %v243_v36  ;;  %v481_v47 = vld [vmem:[%s660_s6] ss:$0 sm:$0xff] }
  0x1b   :  { %142 = vmatpush.bf16.msra.mxu0 %v455_v6  ;;  %v159_v27 = vunpack.c.l.bf16 %v157_v24  ;;  %v247_v38 = vperm.slane %v245_v37, 0 }
  0x1c   :  { %232 = vmatpush.bf16.msra.mxu1 %v463_v7  ;;  %325 = vmatpush.bf16.msra.mxu2 %v472_v19 }
  0x1d   :  { %v249_v41 = vunpack.c.l.bf16 %v247_v38 }
  0x1f   :  { %143 = vmatpush.bf16.msra.mxu0 %v454_v8 }
  0x20   :  { %233 = vmatpush.bf16.msra.mxu1 %v462_v9  ;;  %326 = vmatpush.bf16.msra.mxu2 %v471_v20 }
  0x23   :  { %144 = vmatpush.bf16.msra.mxu0 %v453_v10 }
  0x24   :  { %234 = vmatpush.bf16.msra.mxu1 %v461_v14  ;;  %327 = vmatpush.bf16.msra.mxu2 %v470_v23 }
  0x27   :  { %145 = vmatpush.bf16.msra.mxu0 %v452_v11 }
  0x28   :  { %235 = vmatpush.bf16.msra.mxu1 %v460_v15  ;;  %328 = vmatpush.bf16.msra.mxu2 %v469_v33 }
  0x2b   :  { %146 = vmatpush.bf16.msra.mxu0 %v451_v12 }
  0x2c   :  { %236 = vmatpush.bf16.msra.mxu1 %v459_v16  ;;  %329 = vmatpush.bf16.msra.mxu2 %v468_v34 }
  0x2e   :  { %147 = vmatmul.bf16.vlgmr.msra.gmra.mxu0 %v74_v13 }
  0x30   :  { %330 = vmatpush.bf16.msra.mxu2 %v467_v35 }
  0xab   :  { %v148_v25 = vpop.f32.mrf.mxu0 }
  0xac   :  { %v152_v26 = vpack.c.bf16 %v148_v25, %v148_v25 }
  0xae   :  { %v158_v28 = vunpack.c.l.bf16 %v152_v26 }
  0xb0   :  { %v160_v29 = vadd.f32 %v159_v27, %v158_v28 }
  0xb2   :  { %v163_v30 = vmax.f32 %v160_v29, 0.0 }
  0xb3   :  { %v150_v31 = vpop.f32.mrf.mxu0 }
  0xb4   :  { %v164_v32 = vpack.c.bf16 %v163_v30, %v163_v30 }
  0xb6   :  { %237 = vmatmul.bf16.vlgmr.msra.gmra.mxu1 %v164_v32 }
 0x133   :  { %v238_v39 = vpop.f32.mrf.mxu1 }
 0x134   :  { %v242_v40 = vpack.c.bf16 %v238_v39, %v238_v39 }
 0x136   :  { %v248_v42 = vunpack.c.l.bf16 %v242_v40 }
 0x138   :  { %v250_v43 = vadd.f32 %v249_v41, %v248_v42 }
 0x13a   :  { %v253_v44 = vmax.f32 %v250_v43, 0.0 }
 0x13b   :  { %v240_v45 = vpop.f32.mrf.mxu1 }
 0x13c   :  { %v254_v46 = vpack.c.bf16 %v253_v44, %v253_v44 }
 0x13e   :  { %331 = vmatmul.bf16.vlgmr.msra.gmra.mxu2 %v254_v46 }
 0x1c1   :  { %v332_v48 = vpop.f32.mrf.mxu2 }
 0x1c2   :  { %v333_v49 = vadd.f32 %v481_v47, %v332_v48 }
 0x1c4   :  { %336 = vst [vmem:[#allocation8] sm:$0xff] %v333_v49 }
 0x1c5   :  { %347 = dma.vmem_to_hbm [thread:$0]  %s343_s22, 128, %s345_s4, [#allocation4]  }
 0x1c9   :  { %v334_v50 = vpop.f32.mrf.mxu2 }
 0x1ca   :  { %582 = dma.done.wait [#allocation4], 128  }
 0x1cb   :  { %583 = vsyncadd [#allocation4], 4294967168 }
 0x1cc   :  { %352 = vsyncpa [#allocation3], 1 }
 0x1cd   :  { %353 = vsyncpa [#allocation6], 1 }
 0x1ce   :  { %354 = vsyncpa [#allocation4], 1 }

</bundles_post_ra>
